<compile_context>
chip_gen: v6e
topology: v6e:2x2x1
jax: 0.10.0
libtpu: 0.0.40
codegen_flags: <defaults>
</compile_context>

<pallas_src>
import jax
import jax.numpy as jnp
from jax import lax
from jax.experimental import pallas as pl
from jax.experimental.pallas import tpu as pltpu


_LANE = 128                 # vreg lane width
_SINGLE_SHOT_MAX_B = 16384  # up to this many rows: grid-free all-VMEM kernel
_BATCH_TILE = 8192          # lane-axis batch tile for the large-batch path


def _net_kernel(x_ref, w1_ref, b1_ref, w2_ref, b2_ref, out_ref):
    # x  : (Bt, S)   natural (batch, feature) layout
    # w1 : (H, S)    PyTorch (out, in) layout
    # b1 : (H, 1)
    # w2 : (A, H)
    # b2 : (A, 1)
    # out: (A, Bt)   transposed probabilities (batch on the lane axis)
    x = x_ref[...]

    # fc1 + ReLU, computed transposed without materializing x^T:
    #   hT = relu(W1 @ x^T + b1)   via contraction over S on both operands.
    hT = lax.dot_general(
        w1_ref[...], x,
        dimension_numbers=(((1,), (1,)), ((), ())),
        preferred_element_type=jnp.float32)
    hT = jnp.maximum(hT + b1_ref[...], 0.0)

    # fc2: logitsT = W2 @ hT + b2 (bias broadcasts along the lane/batch axis)
    logitsT = (jnp.dot(w2_ref[...], hT, preferred_element_type=jnp.float32)
               + b2_ref[...])

    a_size = out_ref.shape[0]
    if a_size == 2:
        # 2-way softmax == sigmoid of the logit difference; avoids cross-
        # sublane max/sum reductions.  p1 gets its own exp (EUP slot is idle)
        # instead of 1 - p0, so the unlikely action keeps relative accuracy.
        d = logitsT[1:2, :] - logitsT[0:1, :]
        p0 = 1.0 / (1.0 + jnp.exp(d))
        p1 = 1.0 / (1.0 + jnp.exp(-d))
        out_ref[...] = jnp.concatenate([p0, p1], axis=0).astype(out_ref.dtype)
    else:
        # Generic numerically-stable softmax over the action (sublane) axis.
        m = jnp.max(logitsT, axis=0, keepdims=True)
        e = jnp.exp(logitsT - m)
        out_ref[...] = (e / jnp.sum(e, axis=0, keepdims=True)).astype(out_ref.dtype)


def pack_params(w1, b1, w2, b2):
    """w1 (H,S), b1 (H,), w2 (A,H), b2 (A,) -> kernel-ready f32 operands."""
    return (w1.astype(jnp.float32),
            b1[:, None].astype(jnp.float32),
            w2.astype(jnp.float32),
            b2[:, None].astype(jnp.float32))


def _cost(b_rows, s, h, a):
    flops = 2 * b_rows * s * h + 2 * b_rows * h * a
    transcendentals = 2 * b_rows if a == 2 else b_rows * a
    bytes_accessed = 4 * (b_rows * s + h * s + h + a * h + a + a * b_rows)
    return pl.CostEstimate(flops=flops, transcendentals=transcendentals,
                           bytes_accessed=bytes_accessed)


def net_forward(x, w1, b1c, w2, b2c):
    """x: (B, S) f32. w1: (H, S), b1c: (H, 1), w2: (A, H), b2c: (A, 1).

    Returns probabilities of shape (B, A), matching the PyTorch module.
    """
    B, S = x.shape
    H = w1.shape[0]
    A = w2.shape[0]
    x = x.astype(jnp.float32)

    vmem = pl.BlockSpec(memory_space=pltpu.MemorySpace.VMEM)
    bt = _BATCH_TILE
    use_grid = B > _SINGLE_SHOT_MAX_B and pl.cdiv(B, bt) >= 2

    if not use_grid:
        # Single-shot, grid-free: whole operands live in VMEM, no pipelining
        # machinery, one kernel invocation, zero input relayout/padding.
        outT = pl.pallas_call(
            _net_kernel,
            out_shape=jax.ShapeDtypeStruct((A, B), jnp.float32),
            in_specs=[vmem, vmem, vmem, vmem, vmem],
            out_specs=vmem,
            cost_estimate=_cost(B, S, H, A),
        )(x, w1, b1c, w2, b2c)
        return outT.T
    else:
        # Large batch: tile the batch axis with big lane-dense output tiles;
        # weights stay resident across grid steps; "parallel" lets v7x's
        # second TensorCore shard the grid.
        Bp = pl.cdiv(B, bt) * bt
        x_p = jnp.pad(x, ((0, Bp - B), (0, 0)))   # single cheap pad, no transpose
        outT = pl.pallas_call(
            _net_kernel,
            out_shape=jax.ShapeDtypeStruct((A, Bp), jnp.float32),
            grid=(Bp // bt,),
            in_specs=[
                pl.BlockSpec((bt, S), lambda i: (i, 0)),
                pl.BlockSpec((H, S), lambda i: (0, 0)),
                pl.BlockSpec((H, 1), lambda i: (0, 0)),
                pl.BlockSpec((A, H), lambda i: (0, 0)),
                pl.BlockSpec((A, 1), lambda i: (0, 0)),
            ],
            out_specs=pl.BlockSpec((A, bt), lambda i: (0, i)),
            compiler_params=pltpu.CompilerParams(
                dimension_semantics=("parallel",)),
            cost_estimate=_cost(Bp, S, H, A),
        )(x_p, w1, b1c, w2, b2c)
        return outT[:, :B].T


net_forward_jit = jax.jit(net_forward)


def init_params(key, s_size, h_size, a_size):
    """PyTorch nn.Linear-style init, in PyTorch (out, in) layout."""
    k1, k2, k3, k4 = jax.random.split(key, 4)
    bound1 = 1.0 / jnp.sqrt(float(s_size))
    bound2 = 1.0 / jnp.sqrt(float(h_size))
    w1 = jax.random.uniform(k1, (h_size, s_size), jnp.float32, -bound1, bound1)
    b1 = jax.random.uniform(k2, (h_size,), jnp.float32, -bound1, bound1)
    w2 = jax.random.uniform(k3, (a_size, h_size), jnp.float32, -bound2, bound2)
    b2 = jax.random.uniform(k4, (a_size,), jnp.float32, -bound2, bound2)
    return w1, b1, w2, b2


if __name__ == "__main__":
    # CartPole-v0: nS = 4 observations, nA = 2 actions; hidden = 32.
    s_size, h_size, a_size = 4, 32, 2

    key = jax.random.PRNGKey(0)
    kx, kp = jax.random.split(key)
    w1, b1, w2, b2 = init_params(kp, s_size, h_size, a_size)
    w1p, b1c, w2p, b2c = pack_params(w1, b1, w2, b2)

    def ref_forward(x):
        h = jnp.maximum(x @ w1.T + b1, 0.0)
        return jax.nn.softmax(h @ w2.T + b2, axis=1)

    # Small batch -> grid-free all-VMEM path (typical select_action call).
    x_small = jax.random.normal(kx, (2, s_size), jnp.float32)
    probs = jax.block_until_ready(net_forward_jit(x_small, w1p, b1c, w2p, b2c))
    assert probs.shape == (2, a_size)
    assert jnp.allclose(probs, ref_forward(x_small), atol=1e-5, rtol=1e-5)
    assert jnp.allclose(jnp.sum(probs, axis=1), 1.0, atol=1e-5)

    # Large batch -> lane-tiled "parallel" grid path (exercised for coverage).
    x_big = jax.random.normal(kx, (20000, s_size), jnp.float32)
    probs_big = jax.block_until_ready(net_forward_jit(x_big, w1p, b1c, w2p, b2c))
    assert probs_big.shape == (20000, a_size)
    assert jnp.allclose(probs_big, ref_forward(x_big), atol=1e-5, rtol=1e-5)
    assert jnp.allclose(jnp.sum(probs_big, axis=1), 1.0, atol=1e-5)

    # TODO(synk): select_action's Categorical sampling / log_prob is host-side
    # RL glue, not part of the module's forward pass, so it is not kernelized.
    print("KERNEL_OK")
</pallas_src>

<mosaic_0001>
module attributes {stable_mosaic.version = 11 : i64} {
  func.func @_net_kernel(%arg0: memref<2x4xf32, #tpu.memory_space<vmem>>, %arg1: memref<32x4xf32, #tpu.memory_space<vmem>>, %arg2: memref<32x1xf32, #tpu.memory_space<vmem>>, %arg3: memref<2x32xf32, #tpu.memory_space<vmem>>, %arg4: memref<2x1xf32, #tpu.memory_space<vmem>>, %arg5: memref<2x2xf32, #tpu.memory_space<vmem>>) attributes {dimension_semantics = [], scalar_prefetch = 0 : i64, scratch_operands = 0 : i64, tpu.core_type = #tpu.core_type<tc>} {
    %c0 = arith.constant 0 : index
    %c0_0 = arith.constant 0 : index
    %0 = vector.load %arg0[%c0, %c0_0] : memref<2x4xf32, #tpu.memory_space<vmem>>, vector<2x4xf32>
    %c0_1 = arith.constant 0 : index
    %c0_2 = arith.constant 0 : index
    %1 = vector.load %arg1[%c0_1, %c0_2] : memref<32x4xf32, #tpu.memory_space<vmem>>, vector<32x4xf32>
    %cst = arith.constant dense<0.000000e+00> : vector<32x2xf32>
    %2 = tpu.matmul %1, %0, %cst {dimension_numbers = #tpu.dot_dimension_numbers<[1], [1], [0], [0], [0, 0, 1, 0], [], []>} : vector<32x4xf32>, vector<2x4xf32>, vector<32x2xf32> -> vector<32x2xf32>
    %c0_3 = arith.constant 0 : index
    %c0_4 = arith.constant 0 : index
    %3 = vector.load %arg2[%c0_3, %c0_4] : memref<32x1xf32, #tpu.memory_space<vmem>>, vector<32x1xf32>
    %4 = vector.broadcast %3 : vector<32x1xf32> to vector<32x2xf32>
    %5 = arith.addf %2, %4 : vector<32x2xf32>
    %cst_5 = arith.constant 0.000000e+00 : f32
    %6 = vector.broadcast %cst_5 : f32 to vector<32x2xf32>
    %7 = arith.maximumf %5, %6 : vector<32x2xf32>
    %c0_6 = arith.constant 0 : index
    %c0_7 = arith.constant 0 : index
    %8 = vector.load %arg3[%c0_6, %c0_7] : memref<2x32xf32, #tpu.memory_space<vmem>>, vector<2x32xf32>
    %cst_8 = arith.constant dense<0.000000e+00> : vector<2x2xf32>
    %9 = tpu.matmul %8, %7, %cst_8 {dimension_numbers = #tpu.dot_dimension_numbers<[1], [0], [0], [1], [0, 0, 1, 1], [], []>} : vector<2x32xf32>, vector<32x2xf32>, vector<2x2xf32> -> vector<2x2xf32>
    %c0_9 = arith.constant 0 : index
    %c0_10 = arith.constant 0 : index
    %10 = vector.load %arg4[%c0_9, %c0_10] : memref<2x1xf32, #tpu.memory_space<vmem>>, vector<2x1xf32>
    %11 = vector.broadcast %10 : vector<2x1xf32> to vector<2x2xf32>
    %12 = arith.addf %9, %11 : vector<2x2xf32>
    %13 = vector.extract_strided_slice %12 {offsets = [1, 0], sizes = [1, 2], strides = [1, 1]} : vector<2x2xf32> to vector<1x2xf32>
    %14 = vector.extract_strided_slice %12 {offsets = [0, 0], sizes = [1, 2], strides = [1, 1]} : vector<2x2xf32> to vector<1x2xf32>
    %15 = arith.subf %13, %14 : vector<1x2xf32>
    %16 = math.exp %15 : vector<1x2xf32>
    %cst_11 = arith.constant 1.000000e+00 : f32
    %17 = vector.broadcast %cst_11 : f32 to vector<1x2xf32>
    %18 = arith.addf %17, %16 : vector<1x2xf32>
    %cst_12 = arith.constant 1.000000e+00 : f32
    %19 = vector.broadcast %cst_12 : f32 to vector<1x2xf32>
    %20 = arith.divf %19, %18 : vector<1x2xf32>
    %cst_13 = arith.constant 0.000000e+00 : f32
    %21 = vector.broadcast %cst_13 : f32 to vector<1x2xf32>
    %22 = arith.subf %21, %15 : vector<1x2xf32>
    %23 = math.exp %22 : vector<1x2xf32>
    %cst_14 = arith.constant 1.000000e+00 : f32
    %24 = vector.broadcast %cst_14 : f32 to vector<1x2xf32>
    %25 = arith.addf %24, %23 : vector<1x2xf32>
    %cst_15 = arith.constant 1.000000e+00 : f32
    %26 = vector.broadcast %cst_15 : f32 to vector<1x2xf32>
    %27 = arith.divf %26, %25 : vector<1x2xf32>
    %28 = tpu.concatenate %20, %27 in 0 : vector<1x2xf32>, vector<1x2xf32> -> vector<2x2xf32>
    %c0_16 = arith.constant 0 : index
    %c0_17 = arith.constant 0 : index
    %29 = vector.load %arg5[%c0_16, %c0_17] : memref<2x2xf32, #tpu.memory_space<vmem>>, vector<2x2xf32>
    tpu.vector_store %arg5[%c0_16, %c0_17], %28 {strides = array<i32>} : memref<2x2xf32, #tpu.memory_space<vmem>>, vector<2x2xf32>,
    return
  }
}

</mosaic_0001>

<bundles_post_ra>
// kernel: net_forward.1
= control target key start
LH: loop header
LB: loop body
LE: loop exit
PB: predicated region body
PF: predicated region fallthrough
CT: control target
= control target key end

     0   :  { %vm49_vm0 = vcmask 31744   ;;  %v309_v2 = vmov 0   ;;  %v310_v11 = vmov 0.0   ;;  %vm311_vm1 = vmmov 0   ;;  %s384_s0 = inlined_call_operand.vmem [shape: f32[2,4], index: 0, kind: input, shape index: {}]   ;;  %s385_s1 = inlined_call_operand.vmem [shape: f32[32,4], index: 1, kind: input, shape index: {}]   ;;  %s386_s2 = inlined_call_operand.vmem [shape: f32[32,1], index: 2, kind: input, shape index: {}]   ;;  %s387_s4 = inlined_call_operand.vmem [shape: f32[2,1], index: 4, kind: input, shape index: {}]   ;;  %s388_s3 = inlined_call_operand.vmem [shape: f32[2,32], index: 3, kind: input, shape index: {}]   ;;  %s389_s5 = inlined_call_operand.vmem [shape: f32[2,2], index: 5, kind: output, shape index: {}]  }
   0x1   :  { %v20_v0 = vld [vmem:[%s384_s0] sm:$0x3]  ;;  %299 = vset.pattern.permute.xlu0 %v309_v2  ;;  %300 = vset.pattern.permute.xlu1 %v309_v2  ;;  %v28_v3 = vld [vmem:[%s386_s2 + $0x18] sm:$0xff]  ;;  %v22_v4 = vld [vmem:[%s385_s1 + $0x8] sm:$0xff]  ;;  %vm161_vm2 = vcmask 261120   ;;  %vm253_vm3 = vcmask 1040384  }
   0x2   :  { %v21_v1 = vld [vmem:[%s385_s1] sm:$0xff]  ;;  %277 = vmatprep.subr.msk.mxu0 %vm49_vm0, %v20_v0  ;;  %46 = vperm.xlu0 %299, %v28_v3   ;;  %v26_v5 = vld [vmem:[%s386_s2 + $0x8] sm:$0xff]  ;;  %v23_v6 = vld [vmem:[%s385_s1 + $0x10] sm:$0xff]  ;;  %vm255_vm4 = vcmask 9216  }
   0x3   :  { %279 = vmatprep.mubr.msk.f32.mxu0 %vm49_vm0, %v21_v1  ;;  %278 = vmatpush3.xpose.msk.msra.mxu0 %vm49_vm0, %v20_v0  ;;  %v27_v7 = vld [vmem:[%s386_s2 + $0x10] sm:$0xff]  ;;  %v25_v8 = vld [vmem:[%s386_s2] sm:$0xff]  ;;  %v24_v9 = vld [vmem:[%s385_s1 + $0x18] sm:$0xff] }
   0x4   :  { %36 = vperm.xlu1 %300, %v26_v5   ;;  %v155_v10 = vld [vmem:[%s387_s4] sm:$0x3]  ;;  %285 = vmatprep.subr.mxu1 %v310_v11 }
   0x5   :  { %293 = vmatprep.mubr.msk.f32.mxu1 %vm311_vm1, %v310_v11  ;;  %v154_v28 = vld [vmem:[%s388_s3] sm:$0x3] }
   0x6   :  { %280 = vmatmul.mubr.msk.f32.vlgmr.msra.gmra.mxu0 %vm49_vm0, %v22_v4  ;;  %41 = vperm.xlu0 %299, %v27_v7  }
   0x7   :  { %282 = vmatprep.mubr.msk.f32.mxu0 %vm49_vm0, %v23_v6 }
   0x8   :  { %31 = vperm.xlu1 %300, %v25_v8  }
   0xa   :  { %283 = vmatmul.mubr.msk.f32.gmra.mxu0 %vm49_vm0, %v24_v9  ;;  %158 = vperm.xlu0 %299, %v155_v10  }
  0x7d   :  { %v47_v12 = vpop.permute.xlu0 %46 }
  0x7f   :  { %v37_v13 = vpop.permute.xlu1 %36 }
  0x81   :  { %v42_v17 = vpop.permute.xlu0 %41 }
  0x83   :  { %v32_v19 = vpop.permute.xlu1 %31 }
  0x85   :  { %v159_v29 = vpop.permute.xlu0 %158 }
  0xc6   :  { %v281_v14 = vpop.f32.mrf.mxu0 }
  0xc7   :  { %v137_v21 = vadd.f32 %v281_v14, %v37_v13 }
  0xc8   :  { %v131_v15 = vpop.f32.mrf.mxu0 }
  0xc9   :  { %v132_v24 = vadd.f32 %v131_v15, %v32_v19  ;;  %v151_v26 = vmax.f32 %v137_v21, 0.0 }
  0xca   :  { %v284_v16 = vpop.f32.mrf.mxu0 }
  0xcb   :  { %v147_v18 = vadd.f32 %v284_v16, %v47_v12  ;;  %v150_v27 = vmax.f32 %v132_v24, 0.0 }
  0xcc   :  { %v141_v20 = vpop.f32.mrf.mxu0 }
  0xcd   :  { %v153_v22 = vmax.f32 %v147_v18, 0.0  ;;  %v142_v23 = vadd.f32 %v141_v20, %v42_v17 }
  0xcf   :  { %v152_v25 = vmax.f32 %v142_v23, 0.0  ;;  %286 = vmatpush3.msra.mxu1 %v153_v22 }
  0xd0   :  { %287 = vmatprep.subr.mxu1 %v310_v11 }
  0xd1   :  { %288 = vmatpush3.msra.mxu1 %v152_v25 }
  0xd2   :  { %289 = vmatprep.subr.mxu1 %v310_v11 }
  0xd3   :  { %290 = vmatpush3.msra.mxu1 %v151_v26 }
  0xd4   :  { %291 = vmatprep.subr.mxu1 %v310_v11 }
  0xd5   :  { %292 = vmatpush3.msra.mxu1 %v150_v27 }
  0xd6   :  { %294 = vmatmul.mubr.msk.f32.vlgmr.msra.gmra.mxu1 %vm161_vm2, %v154_v28 }
 0x196   :  { %v231_v30 = vpop.f32.mrf.mxu1 }
 0x197   :  { %v232_v31 = vadd.f32 %v231_v30, %v159_v29 }
 0x198   :  { %v295_v32 = vpop.f32.mrf.mxu1 }
 0x199   :  { %v236_v33 = vrot.slane %v232_v31, 7 }
 0x19b   :  { %v238_v34 = vsub.f32 %v232_v31, %v236_v33 }
 0x19d   :  { %v239_v35 = vmul.f32 1.442695, %v238_v34  ;;  %v244_v36 = vsub.f32 0.0, %v238_v34 }
 0x19f   :  { %301 = vpow2.f32 %v239_v35  ;;  %v245_v37 = vmul.f32 1.442695, %v244_v36 }
 0x1a1   :  { %303 = vpow2.f32 %v245_v37 }
 0x1ac   :  { %v302_v38 = vpop.eup %301 }
 0x1ad   :  { %v241_v39 = vadd.f32 1.0, %v302_v38 }
 0x1ae   :  { %v304_v40 = vpop.eup %303 }
 0x1af   :  { %305 = vrcp.f32 %v241_v39  ;;  %v247_v41 = vadd.f32 1.0, %v304_v40 }
 0x1b1   :  { %307 = vrcp.f32 %v247_v41 }
 0x1bc   :  { %v306_v42 = vpop.eup %305 }
 0x1bd   :  { %v251_v43 = vrot.slane %v306_v42, 1 }
 0x1be   :  { %v308_v44 = vpop.eup %307 }
 0x1bf   :  { %v254_v45 = vsel %vm253_vm3, %v251_v43, %v308_v44 }
 0x1c0   :  { %256 = vst.msk [vmem:[%s389_s5] sm:$0x3] %vm255_vm4, %v254_v45 }

</bundles_post_ra>
